<compile_context>
chip_gen: v5e
topology: v5e:2x2
jax: 0.10.0
libtpu: 0.0.40
codegen_flags: <defaults>
</compile_context>

<pallas_src>
import jax
import jax.numpy as jnp
import numpy as np
from jax.experimental import pallas as pl
from jax.experimental.pallas import tpu as pltpu


def modres_kernel(x_ref, mod_ref, w1_ref, b1_ref, w2_ref, b2_ref, o_ref):
    x = x_ref[...]                                        # (bt, st, F) f32
    mod = mod_ref[...]                                    # (bt, 2,  F) f32
    cs = mod[:, 0:1, :]                                   # gamma*(1+scale)
    csh = mod[:, 1:2, :]                                  # beta*(1+scale)+shift

    # ---- LayerNorm over the feature dim (eps = 1e-5), stats in f32 ----
    mean = jnp.mean(x, axis=-1, keepdims=True)
    centered = x - mean
    var = jnp.mean(centered * centered, axis=-1, keepdims=True)
    xhat = centered * jax.lax.rsqrt(var + 1e-5)

    # ---- fused affine-LN + modulation (per-batch vectors broadcast over seq) ----
    modulated = xhat * cs + csh                           # (bt, st, F) f32

    # ---- residual MLP: Linear -> ReLU -> Linear on flattened (bt*st, F) rows ----
    bt, st, f = x.shape
    m2 = modulated.reshape(bt * st, f)                    # view: st is sublane-aligned
    mdt = w1_ref.dtype                                    # MXU operand dtype (bf16 default)
    h = jnp.dot(m2.astype(mdt), w1_ref[...],
                preferred_element_type=jnp.float32) + b1_ref[...]
    h = jnp.maximum(h, 0.0)
    out = jnp.dot(h.astype(mdt), w2_ref[...],
                  preferred_element_type=jnp.float32) + b2_ref[...]

    # ---- residual add in f32, full-F store (lane-dense when F % 128 == 0) ----
    o_ref[...] = x + out.reshape(bt, st, f)


def _device_defaults():
    """(target_rows, vmem_limit_bytes) tuned to the TPU generation's VMEM budget."""
    try:
        vmem = pltpu.get_tpu_info().vmem_capacity_bytes
    except Exception:
        vmem = None
    if vmem is None or vmem <= 80 * 1024 * 1024:
        # v7x-class (64 MiB per TC) or unknown: conservative, leave compiler headroom.
        return 512, 56 * 1024 * 1024
    # v5e / v6e: 128 MiB physical; raise scoped limit well above the 16/32 MiB default.
    return 1024, 96 * 1024 * 1024


def _pick_tiles(B, S, *, target_rows=512, min_steps=4):
    """Pick (batch_tile, seq_tile): seq tile sublane-aligned (or full S), block near
    target_rows, and >= min_steps grid steps when possible (>=2 per v7x TensorCore)."""
    st_opts = [d for d in range(1, S + 1) if S % d == 0 and (d % 8 == 0 or d == S)]
    bt_opts = [d for d in range(1, B + 1) if B % d == 0]
    best_key, best = None, (1, st_opts[0])
    for bt in bt_opts:
        for st in st_opts:
            rows = bt * st
            steps = (B // bt) * (S // st)
            fits = rows <= target_rows
            key = (fits, min(steps, min_steps), rows if fits else -rows)
            if best_key is None or key > best_key:
                best_key, best = key, (bt, st)
    return best


def modulated_res_block(x, modulator, params, *, batch_tile=None, seq_tile=None,
                        matmul_dtype=jnp.bfloat16, weight_buffer_count=1,
                        target_rows=None, vmem_limit_bytes=None):
    """x: (B, S, F) f32, modulator: (B, M) f32. Linear weights stored as (in, out)."""
    B, S, F = x.shape
    gamma, beta, w1, b1, w2, b2, wmod, bmod = params

    # ---- hoisted modulator MLP + LN-affine/modulation fusion (plain XLA, batched) ----
    ss = jnp.dot(modulator, wmod, preferred_element_type=jnp.float32) + bmod  # (B, 2F)
    scale, shift = ss[:, :F], ss[:, F:]
    one_plus = 1.0 + scale
    cs = gamma * one_plus                                  # (B, F)
    csh = beta * one_plus + shift                          # (B, F)
    mod = jnp.stack([cs, csh], axis=1)                     # (B, 2, F): one DMA per step

    if matmul_dtype is not None:                           # bf16 MXU operands, f32 accum
        w1c, w2c = w1.astype(matmul_dtype), w2.astype(matmul_dtype)
    else:
        w1c, w2c = w1, w2

    d_rows, d_vmem = _device_defaults()
    if target_rows is None:
        target_rows = d_rows
    if vmem_limit_bytes is None:
        vmem_limit_bytes = d_vmem

    bt, st = _pick_tiles(B, S, target_rows=target_rows)
    if batch_tile is not None:
        bt = batch_tile
    if seq_tile is not None:
        st = seq_tile
    assert B % bt == 0 and S % st == 0, "tiles must divide (B, S)"
    assert st % 8 == 0 or st == S, "seq tile must be sublane-aligned (or the full S)"

    grid = (B // bt, S // st)
    witem = jnp.dtype(w1c.dtype).itemsize
    cost = pl.CostEstimate(
        flops=4 * B * S * F * F,                           # two (B*S,F)@(F,F) matmuls
        transcendentals=0,
        bytes_accessed=int(8 * B * S * F + 2 * F * F * witem + 8 * B * F),
    )

    def build(use_buffered):
        def _w_spec(shape):
            idx = lambda b, s: (0,) * len(shape)
            if use_buffered and weight_buffer_count is not None:
                # Constant index maps -> single-buffer the weights (halves their VMEM).
                return pl.BlockSpec(shape, idx,
                                    pipeline_mode=pl.Buffered(weight_buffer_count))
            return pl.BlockSpec(shape, idx)

        # TODO(synk): for F >= ~2K (bf16) add K/N tiling of w1/w2 with an f32
        # accumulator scratch and an "arbitrary" reduction grid axis -- on v7x
        # (64 MiB VMEM) both full FxF weights cannot stay resident at that size.
        return pl.pallas_call(
            modres_kernel,
            out_shape=jax.ShapeDtypeStruct((B, S, F), x.dtype),
            grid_spec=pltpu.PrefetchScalarGridSpec(
                num_scalar_prefetch=0,
                grid=grid,
                in_specs=[
                    pl.BlockSpec((bt, st, F), lambda b, s: (b, s, 0)),   # x
                    pl.BlockSpec((bt, 2, F), lambda b, s: (b, 0, 0)),    # cs/csh stacked
                    _w_spec((F, F)),                                     # w1
                    _w_spec((1, F)),                                     # b1 (f32)
                    _w_spec((F, F)),                                     # w2
                    _w_spec((1, F)),                                     # b2 (f32)
                ],
                out_specs=pl.BlockSpec((bt, st, F), lambda b, s: (b, s, 0)),
            ),
            compiler_params=pltpu.CompilerParams(
                dimension_semantics=("parallel", "parallel"),
                vmem_limit_bytes=vmem_limit_bytes),
            cost_estimate=cost,
        )

    args = (x, mod, w1c, b1, w2c, b2)
    if weight_buffer_count is None:
        return build(False)(*args)
    try:
        return build(True)(*args)
    except Exception:
        # This jax build rejected pl.Buffered(weight_buffer_count); fall back to the
        # default double-buffered weights (correctness identical, slightly more VMEM).
        return build(False)(*args)


def reference(x, modulator, params, matmul_dtype=None):
    gamma, beta, w1, b1, w2, b2, wmod, bmod = params
    F = x.shape[-1]
    mean = jnp.mean(x, axis=-1, keepdims=True)
    var = jnp.mean((x - mean) ** 2, axis=-1, keepdims=True)
    normed = (x - mean) / jnp.sqrt(var + 1e-5) * gamma + beta
    ss = (modulator @ wmod + bmod)[:, None, :]             # unsqueeze(1)
    scale, shift = ss[..., :F], ss[..., F:]
    modulated = normed * (1.0 + scale) + shift
    dt = matmul_dtype if matmul_dtype is not None else x.dtype
    h = jnp.maximum(jnp.dot(modulated.astype(dt), w1.astype(dt),
                            preferred_element_type=jnp.float32) + b1, 0.0)
    out = jnp.dot(h.astype(dt), w2.astype(dt),
                  preferred_element_type=jnp.float32) + b2
    return x + out


def _make_params(key, F, M):
    keys = jax.random.split(key, 6)
    gamma = jnp.ones((1, F), dtype=jnp.float32)                        # LayerNorm weight
    beta = jnp.zeros((1, F), dtype=jnp.float32)                        # LayerNorm bias
    w1 = jax.random.normal(keys[0], (F, F), dtype=jnp.float32) * 0.1   # Linear(F,F), (in,out)
    b1 = jax.random.normal(keys[1], (1, F), dtype=jnp.float32) * 0.1
    w2 = jax.random.normal(keys[2], (F, F), dtype=jnp.float32) * 0.1
    b2 = jax.random.normal(keys[3], (1, F), dtype=jnp.float32) * 0.1
    wmod = jax.random.normal(keys[4], (M, 2 * F), dtype=jnp.float32) * 0.1
    bmod = jax.random.normal(keys[5], (1, 2 * F), dtype=jnp.float32) * 0.1
    return (gamma, beta, w1, b1, w2, b2, wmod, bmod)


if __name__ == "__main__":
    B, S, F, M = 2, 8, 32, 16   # batch, seq, features_dim, modulator_dim

    key = jax.random.PRNGKey(0)
    kx, km, kp, kx2, km2 = jax.random.split(key, 5)

    x = jax.random.normal(kx, (B, S, F), dtype=jnp.float32)
    modulator = jax.random.normal(km, (B, M), dtype=jnp.float32)
    params = _make_params(kp, F, M)

    # 1) Default path: bf16 MXU operands, single-buffered weights, auto tiling.
    y_bf = jax.block_until_ready(modulated_res_block(x, modulator, params))
    y_bf_ref = reference(x, modulator, params, matmul_dtype=jnp.bfloat16)
    np.testing.assert_allclose(np.asarray(y_bf), np.asarray(y_bf_ref), rtol=2e-2, atol=2e-2)

    # 2) Full-f32 matmul path, exact check.
    y_f32 = jax.block_until_ready(modulated_res_block(x, modulator, params,
                                                      matmul_dtype=None))
    y_ref = reference(x, modulator, params)
    np.testing.assert_allclose(np.asarray(y_f32), np.asarray(y_ref), rtol=1e-5, atol=1e-5)

    # 3) Single block spanning both batches (exercises the flattened (bt*st,F) rows)
    #    plus double-buffered weights path.
    y_one = jax.block_until_ready(modulated_res_block(
        x, modulator, params, matmul_dtype=None, batch_tile=2, seq_tile=8,
        weight_buffer_count=None))
    np.testing.assert_allclose(np.asarray(y_one), np.asarray(y_ref), rtol=1e-5, atol=1e-5)

    # 4) Small-B / larger-S case: exercises the seq-tile grid axis (>=4 grid steps).
    B2, S2 = 1, 32
    x2 = jax.random.normal(kx2, (B2, S2, F), dtype=jnp.float32)
    mod2 = jax.random.normal(km2, (B2, M), dtype=jnp.float32)
    y2 = jax.block_until_ready(modulated_res_block(x2, mod2, params, matmul_dtype=None,
                                                   target_rows=8))
    y2_ref = reference(x2, mod2, params)
    np.testing.assert_allclose(np.asarray(y2), np.asarray(y2_ref), rtol=1e-5, atol=1e-5)

    print("KERNEL_OK")
</pallas_src>

<mosaic_0001>
module attributes {stable_mosaic.version = 11 : i64} {
  func.func @modres_kernel(%arg0: i32, %arg1: i32, %arg2: memref<1x8x32xf32, #tpu.memory_space<vmem>>, %arg3: memref<1x2x32xf32, #tpu.memory_space<vmem>>, %arg4: memref<32x32xbf16, #tpu.memory_space<vmem>>, %arg5: memref<1x32xf32, #tpu.memory_space<vmem>>, %arg6: memref<32x32xbf16, #tpu.memory_space<vmem>>, %arg7: memref<1x32xf32, #tpu.memory_space<vmem>>, %arg8: memref<1x8x32xf32, #tpu.memory_space<vmem>>) attributes {dimension_semantics = [#tpu.dimension_semantics<parallel>, #tpu.dimension_semantics<parallel>], iteration_bounds = array<i64: 2, 1>, scalar_prefetch = 0 : i64, scratch_operands = 0 : i64, tpu.core_type = #tpu.core_type<tc>, window_params = [{transform_indices = @transform_0, window_bounds = array<i64: 1, 8, 32>}, {transform_indices = @transform_1, window_bounds = array<i64: 1, 2, 32>}, {pipeline_mode = #tpu.pipeline_mode<synchronous>, transform_indices = @transform_2, window_bounds = array<i64: 32, 32>}, {pipeline_mode = #tpu.pipeline_mode<synchronous>, transform_indices = @transform_3, window_bounds = array<i64: 1, 32>}, {pipeline_mode = #tpu.pipeline_mode<synchronous>, transform_indices = @transform_4, window_bounds = array<i64: 32, 32>}, {pipeline_mode = #tpu.pipeline_mode<synchronous>, transform_indices = @transform_5, window_bounds = array<i64: 1, 32>}, {transform_indices = @transform_6, window_bounds = array<i64: 1, 8, 32>}]} {
    %c0 = arith.constant 0 : index
    %c0_0 = arith.constant 0 : index
    %c0_1 = arith.constant 0 : index
    %0 = vector.load %arg2[%c0, %c0_0, %c0_1] : memref<1x8x32xf32, #tpu.memory_space<vmem>>, vector<1x8x32xf32>
    %c0_2 = arith.constant 0 : index
    %c0_3 = arith.constant 0 : index
    %c0_4 = arith.constant 0 : index
    %1 = vector.load %arg3[%c0_2, %c0_3, %c0_4] : memref<1x2x32xf32, #tpu.memory_space<vmem>>, vector<1x2x32xf32>
    %2 = vector.extract_strided_slice %1 {offsets = [0, 0, 0], sizes = [1, 1, 32], strides = [1, 1, 1]} : vector<1x2x32xf32> to vector<1x1x32xf32>
    %3 = vector.extract_strided_slice %1 {offsets = [0, 1, 0], sizes = [1, 1, 32], strides = [1, 1, 1]} : vector<1x2x32xf32> to vector<1x1x32xf32>
    %cst = arith.constant dense<0.000000e+00> : vector<1x8xf32>
    %4 = vector.multi_reduction <add>, %0, %cst [2] : vector<1x8x32xf32> to vector<1x8xf32>
    %5 = vector.shape_cast %4 : vector<1x8xf32> to vector<1x8x1xf32>
    %cst_5 = arith.constant 3.200000e+01 : f32
    %6 = vector.broadcast %cst_5 : f32 to vector<1x8x1xf32>
    %7 = arith.divf %5, %6 : vector<1x8x1xf32>
    %8 = vector.broadcast %7 : vector<1x8x1xf32> to vector<1x8x32xf32>
    %9 = arith.subf %0, %8 : vector<1x8x32xf32>
    %10 = arith.mulf %9, %9 : vector<1x8x32xf32>
    %cst_6 = arith.constant dense<0.000000e+00> : vector<1x8xf32>
    %11 = vector.multi_reduction <add>, %10, %cst_6 [2] : vector<1x8x32xf32> to vector<1x8xf32>
    %12 = vector.shape_cast %11 : vector<1x8xf32> to vector<1x8x1xf32>
    %cst_7 = arith.constant 3.200000e+01 : f32
    %13 = vector.broadcast %cst_7 : f32 to vector<1x8x1xf32>
    %14 = arith.divf %12, %13 : vector<1x8x1xf32>
    %cst_8 = arith.constant 9.99999974E-6 : f32
    %15 = vector.broadcast %cst_8 : f32 to vector<1x8x1xf32>
    %16 = arith.addf %14, %15 : vector<1x8x1xf32>
    %17 = math.rsqrt %16 : vector<1x8x1xf32>
    %18 = vector.broadcast %17 : vector<1x8x1xf32> to vector<1x8x32xf32>
    %19 = arith.mulf %9, %18 : vector<1x8x32xf32>
    %20 = vector.broadcast %2 : vector<1x1x32xf32> to vector<1x8x32xf32>
    %21 = arith.mulf %19, %20 : vector<1x8x32xf32>
    %22 = vector.broadcast %3 : vector<1x1x32xf32> to vector<1x8x32xf32>
    %23 = arith.addf %21, %22 : vector<1x8x32xf32>
    %24 = vector.shape_cast %23 : vector<1x8x32xf32> to vector<8x32xf32>
    %25 = arith.truncf %24 : vector<8x32xf32> to vector<8x32xbf16>
    %c0_9 = arith.constant 0 : index
    %c0_10 = arith.constant 0 : index
    %26 = vector.load %arg4[%c0_9, %c0_10] : memref<32x32xbf16, #tpu.memory_space<vmem>>, vector<32x32xbf16>
    %cst_11 = arith.constant dense<0.000000e+00> : vector<8x32xf32>
    %27 = tpu.matmul %25, %26, %cst_11 {dimension_numbers = #tpu.dot_dimension_numbers<[1], [0], [0], [1], [0, 0, 1, 1], [], []>} : vector<8x32xbf16>, vector<32x32xbf16>, vector<8x32xf32> -> vector<8x32xf32>
    %c0_12 = arith.constant 0 : index
    %c0_13 = arith.constant 0 : index
    %28 = vector.load %arg5[%c0_12, %c0_13] : memref<1x32xf32, #tpu.memory_space<vmem>>, vector<1x32xf32>
    %29 = vector.broadcast %28 : vector<1x32xf32> to vector<8x32xf32>
    %30 = arith.addf %27, %29 : vector<8x32xf32>
    %cst_14 = arith.constant 0.000000e+00 : f32
    %31 = vector.broadcast %cst_14 : f32 to vector<8x32xf32>
    %32 = arith.maximumf %30, %31 : vector<8x32xf32>
    %33 = arith.truncf %32 : vector<8x32xf32> to vector<8x32xbf16>
    %c0_15 = arith.constant 0 : index
    %c0_16 = arith.constant 0 : index
    %34 = vector.load %arg6[%c0_15, %c0_16] : memref<32x32xbf16, #tpu.memory_space<vmem>>, vector<32x32xbf16>
    %cst_17 = arith.constant dense<0.000000e+00> : vector<8x32xf32>
    %35 = tpu.matmul %33, %34, %cst_17 {dimension_numbers = #tpu.dot_dimension_numbers<[1], [0], [0], [1], [0, 0, 1, 1], [], []>} : vector<8x32xbf16>, vector<32x32xbf16>, vector<8x32xf32> -> vector<8x32xf32>
    %c0_18 = arith.constant 0 : index
    %c0_19 = arith.constant 0 : index
    %36 = vector.load %arg7[%c0_18, %c0_19] : memref<1x32xf32, #tpu.memory_space<vmem>>, vector<1x32xf32>
    %37 = vector.broadcast %36 : vector<1x32xf32> to vector<8x32xf32>
    %38 = arith.addf %35, %37 : vector<8x32xf32>
    %39 = vector.shape_cast %38 : vector<8x32xf32> to vector<1x8x32xf32>
    %40 = arith.addf %0, %39 : vector<1x8x32xf32>
    %c0_20 = arith.constant 0 : index
    %c0_21 = arith.constant 0 : index
    %c0_22 = arith.constant 0 : index
    %41 = vector.load %arg8[%c0_20, %c0_21, %c0_22] : memref<1x8x32xf32, #tpu.memory_space<vmem>>, vector<1x8x32xf32>
    tpu.vector_store %arg8[%c0_20, %c0_21, %c0_22], %40 {strides = array<i32>} : memref<1x8x32xf32, #tpu.memory_space<vmem>>, vector<1x8x32xf32>,
    return
  }
  func.func @transform_0(%arg0: i32, %arg1: i32) -> (i32, i32, i32) {
    %c0_i32 = arith.constant 0 : i32
    %c0_i32_0 = arith.constant 0 : i32
    return %arg0, %arg1, %c0_i32 : i32, i32, i32
  }
  func.func @transform_1(%arg0: i32, %arg1: i32) -> (i32, i32, i32) {
    %c0_i32 = arith.constant 0 : i32
    %c0_i32_0 = arith.constant 0 : i32
    %c0_i32_1 = arith.constant 0 : i32
    return %arg0, %c0_i32, %c0_i32_0 : i32, i32, i32
  }
  func.func @transform_2(%arg0: i32, %arg1: i32) -> (i32, i32) {
    %c0_i32 = arith.constant 0 : i32
    %c0_i32_0 = arith.constant 0 : i32
    %c0_i32_1 = arith.constant 0 : i32
    return %c0_i32, %c0_i32_0 : i32, i32
  }
  func.func @transform_3(%arg0: i32, %arg1: i32) -> (i32, i32) {
    %c0_i32 = arith.constant 0 : i32
    %c0_i32_0 = arith.constant 0 : i32
    %c0_i32_1 = arith.constant 0 : i32
    return %c0_i32, %c0_i32_0 : i32, i32
  }
  func.func @transform_4(%arg0: i32, %arg1: i32) -> (i32, i32) {
    %c0_i32 = arith.constant 0 : i32
    %c0_i32_0 = arith.constant 0 : i32
    %c0_i32_1 = arith.constant 0 : i32
    return %c0_i32, %c0_i32_0 : i32, i32
  }
  func.func @transform_5(%arg0: i32, %arg1: i32) -> (i32, i32) {
    %c0_i32 = arith.constant 0 : i32
    %c0_i32_0 = arith.constant 0 : i32
    %c0_i32_1 = arith.constant 0 : i32
    return %c0_i32, %c0_i32_0 : i32, i32
  }
  func.func @transform_6(%arg0: i32, %arg1: i32) -> (i32, i32, i32) {
    %c0_i32 = arith.constant 0 : i32
    %c0_i32_0 = arith.constant 0 : i32
    return %arg0, %arg1, %c0_i32 : i32, i32, i32
  }
}

module attributes {stable_mosaic.version = 11 : i64} {
  func.func @modres_kernel(%arg0: i32, %arg1: i32, %arg2: memref<1x8x32xf32, #tpu.memory_space<vmem>>, %arg3: memref<1x2x32xf32, #tpu.memory_space<vmem>>, %arg4: memref<32x32xbf16, #tpu.memory_space<vmem>>, %arg5: memref<1x32xf32, #tpu.memory_space<vmem>>, %arg6: memref<32x32xbf16, #tpu.memory_space<vmem>>, %arg7: memref<1x32xf32, #tpu.memory_space<vmem>>, %arg8: memref<1x8x32xf32, #tpu.memory_space<vmem>>) attributes {dimension_semantics = [#tpu.dimension_semantics<parallel>, #tpu.dimension_semantics<parallel>], iteration_bounds = array<i64: 2, 1>, scalar_prefetch = 0 : i64, scratch_operands = 0 : i64, tpu.core_type = #tpu.core_type<tc>, window_params = [{transform_indices = @transform_0, window_bounds = array<i64: 1, 8, 32>}, {transform_indices = @transform_1, window_bounds = array<i64: 1, 2, 32>}, {pipeline_mode = #tpu.pipeline_mode<synchronous>, transform_indices = @transform_2, window_bounds = array<i64: 32, 32>}, {pipeline_mode = #tpu.pipeline_mode<synchronous>, transform_indices = @transform_3, window_bounds = array<i64: 1, 32>}, {pipeline_mode = #tpu.pipeline_mode<synchronous>, transform_indices = @transform_4, window_bounds = array<i64: 32, 32>}, {pipeline_mode = #tpu.pipeline_mode<synchronous>, transform_indices = @transform_5, window_bounds = array<i64: 1, 32>}, {transform_indices = @transform_6, window_bounds = array<i64: 1, 8, 32>}]} {
    %c0 = arith.constant 0 : index
    %c0_0 = arith.constant 0 : index
    %c0_1 = arith.constant 0 : index
    %0 = vector.load %arg2[%c0, %c0_0, %c0_1] : memref<1x8x32xf32, #tpu.memory_space<vmem>>, vector<1x8x32xf32>
    %c0_2 = arith.constant 0 : index
    %c0_3 = arith.constant 0 : index
    %c0_4 = arith.constant 0 : index
    %1 = vector.load %arg3[%c0_2, %c0_3, %c0_4] : memref<1x2x32xf32, #tpu.memory_space<vmem>>, vector<1x2x32xf32>
    %2 = vector.extract_strided_slice %1 {offsets = [0, 0, 0], sizes = [1, 1, 32], strides = [1, 1, 1]} : vector<1x2x32xf32> to vector<1x1x32xf32>
    %3 = vector.extract_strided_slice %1 {offsets = [0, 1, 0], sizes = [1, 1, 32], strides = [1, 1, 1]} : vector<1x2x32xf32> to vector<1x1x32xf32>
    %cst = arith.constant dense<0.000000e+00> : vector<1x8xf32>
    %4 = vector.multi_reduction <add>, %0, %cst [2] : vector<1x8x32xf32> to vector<1x8xf32>
    %5 = vector.shape_cast %4 : vector<1x8xf32> to vector<1x8x1xf32>
    %cst_5 = arith.constant 3.200000e+01 : f32
    %6 = vector.broadcast %cst_5 : f32 to vector<1x8x1xf32>
    %7 = arith.divf %5, %6 : vector<1x8x1xf32>
    %8 = vector.broadcast %7 : vector<1x8x1xf32> to vector<1x8x32xf32>
    %9 = arith.subf %0, %8 : vector<1x8x32xf32>
    %10 = arith.mulf %9, %9 : vector<1x8x32xf32>
    %cst_6 = arith.constant dense<0.000000e+00> : vector<1x8xf32>
    %11 = vector.multi_reduction <add>, %10, %cst_6 [2] : vector<1x8x32xf32> to vector<1x8xf32>
    %12 = vector.shape_cast %11 : vector<1x8xf32> to vector<1x8x1xf32>
    %cst_7 = arith.constant 3.200000e+01 : f32
    %13 = vector.broadcast %cst_7 : f32 to vector<1x8x1xf32>
    %14 = arith.divf %12, %13 : vector<1x8x1xf32>
    %cst_8 = arith.constant 9.99999974E-6 : f32
    %15 = vector.broadcast %cst_8 : f32 to vector<1x8x1xf32>
    %16 = arith.addf %14, %15 : vector<1x8x1xf32>
    %17 = math.rsqrt %16 : vector<1x8x1xf32>
    %18 = vector.broadcast %17 : vector<1x8x1xf32> to vector<1x8x32xf32>
    %19 = arith.mulf %9, %18 : vector<1x8x32xf32>
    %20 = vector.broadcast %2 : vector<1x1x32xf32> to vector<1x8x32xf32>
    %21 = arith.mulf %19, %20 : vector<1x8x32xf32>
    %22 = vector.broadcast %3 : vector<1x1x32xf32> to vector<1x8x32xf32>
    %23 = arith.addf %21, %22 : vector<1x8x32xf32>
    %24 = vector.shape_cast %23 : vector<1x8x32xf32> to vector<8x32xf32>
    %25 = arith.truncf %24 : vector<8x32xf32> to vector<8x32xbf16>
    %c0_9 = arith.constant 0 : index
    %c0_10 = arith.constant 0 : index
    %26 = vector.load %arg4[%c0_9, %c0_10] : memref<32x32xbf16, #tpu.memory_space<vmem>>, vector<32x32xbf16>
    %cst_11 = arith.constant dense<0.000000e+00> : vector<8x32xf32>
    %27 = tpu.matmul %25, %26, %cst_11 {dimension_numbers = #tpu.dot_dimension_numbers<[1], [0], [0], [1], [0, 0, 1, 1], [], []>} : vector<8x32xbf16>, vector<32x32xbf16>, vector<8x32xf32> -> vector<8x32xf32>
    %c0_12 = arith.constant 0 : index
    %c0_13 = arith.constant 0 : index
    %28 = vector.load %arg5[%c0_12, %c0_13] : memref<1x32xf32, #tpu.memory_space<vmem>>, vector<1x32xf32>
    %29 = vector.broadcast %28 : vector<1x32xf32> to vector<8x32xf32>
    %30 = arith.addf %27, %29 : vector<8x32xf32>
    %cst_14 = arith.constant 0.000000e+00 : f32
    %31 = vector.broadcast %cst_14 : f32 to vector<8x32xf32>
    %32 = arith.maximumf %30, %31 : vector<8x32xf32>
    %33 = arith.truncf %32 : vector<8x32xf32> to vector<8x32xbf16>
    %c0_15 = arith.constant 0 : index
    %c0_16 = arith.constant 0 : index
    %34 = vector.load %arg6[%c0_15, %c0_16] : memref<32x32xbf16, #tpu.memory_space<vmem>>, vector<32x32xbf16>
    %cst_17 = arith.constant dense<0.000000e+00> : vector<8x32xf32>
    %35 = tpu.matmul %33, %34, %cst_17 {dimension_numbers = #tpu.dot_dimension_numbers<[1], [0], [0], [1], [0, 0, 1, 1], [], []>} : vector<8x32xbf16>, vector<32x32xbf16>, vector<8x32xf32> -> vector<8x32xf32>
    %c0_18 = arith.constant 0 : index
    %c0_19 = arith.constant 0 : index
    %36 = vector.load %arg7[%c0_18, %c0_19] : memref<1x32xf32, #tpu.memory_space<vmem>>, vector<1x32xf32>
    %37 = vector.broadcast %36 : vector<1x32xf32> to vector<8x32xf32>
    %38 = arith.addf %35, %37 : vector<8x32xf32>
    %39 = vector.shape_cast %38 : vector<8x32xf32> to vector<1x8x32xf32>
    %40 = arith.addf %0, %39 : vector<1x8x32xf32>
    %c0_20 = arith.constant 0 : index
    %c0_21 = arith.constant 0 : index
    %c0_22 = arith.constant 0 : index
    %41 = vector.load %arg8[%c0_20, %c0_21, %c0_22] : memref<1x8x32xf32, #tpu.memory_space<vmem>>, vector<1x8x32xf32>
    tpu.vector_store %arg8[%c0_20, %c0_21, %c0_22], %40 {strides = array<i32>} : memref<1x8x32xf32, #tpu.memory_space<vmem>>, vector<1x8x32xf32>,
    return
  }
  func.func @transform_0(%arg0: i32, %arg1: i32) -> (i32, i32, i32) {
    %c0_i32 = arith.constant 0 : i32
    %c0_i32_0 = arith.constant 0 : i32
    return %arg0, %arg1, %c0_i32 : i32, i32, i32
  }
  func.func @transform_1(%arg0: i32, %arg1: i32) -> (i32, i32, i32) {
    %c0_i32 = arith.constant 0 : i32
    %c0_i32_0 = arith.constant 0 : i32
    %c0_i32_1 = arith.constant 0 : i32
    return %arg0, %c0_i32, %c0_i32_0 : i32, i32, i32
  }
  func.func @transform_2(%arg0: i32, %arg1: i32) -> (i32, i32) {
    %c0_i32 = arith.constant 0 : i32
    %c0_i32_0 = arith.constant 0 : i32
    %c0_i32_1 = arith.constant 0 : i32
    return %c0_i32, %c0_i32_0 : i32, i32
  }
  func.func @transform_3(%arg0: i32, %arg1: i32) -> (i32, i32) {
    %c0_i32 = arith.constant 0 : i32
    %c0_i32_0 = arith.constant 0 : i32
    %c0_i32_1 = arith.constant 0 : i32
    return %c0_i32, %c0_i32_0 : i32, i32
  }
  func.func @transform_4(%arg0: i32, %arg1: i32) -> (i32, i32) {
    %c0_i32 = arith.constant 0 : i32
    %c0_i32_0 = arith.constant 0 : i32
    %c0_i32_1 = arith.constant 0 : i32
    return %c0_i32, %c0_i32_0 : i32, i32
  }
  func.func @transform_5(%arg0: i32, %arg1: i32) -> (i32, i32) {
    %c0_i32 = arith.constant 0 : i32
    %c0_i32_0 = arith.constant 0 : i32
    %c0_i32_1 = arith.constant 0 : i32
    return %c0_i32, %c0_i32_0 : i32, i32
  }
  func.func @transform_6(%arg0: i32, %arg1: i32) -> (i32, i32, i32) {
    %c0_i32 = arith.constant 0 : i32
    %c0_i32_0 = arith.constant 0 : i32
    return %arg0, %arg1, %c0_i32 : i32, i32, i32
  }
}

</mosaic_0001>

<bundles_post_ra>
// kernel: tpu_custom_call.1
= control target key start
LH: loop header
LB: loop body
LE: loop exit
PB: predicated region body
PF: predicated region fallthrough
CT: control target
= control target key end

     0   :  { %s1190_s0 = inlined_call_operand.hbm [shape: f32[2,8,32], index: 0, kind: input, shape index: {}]   ;;  %s1191_s1 = inlined_call_operand.hbm [shape: f32[2,2,32], index: 1, kind: input, shape index: {}]   ;;  %s1192_s2 = inlined_call_operand.hbm [shape: bf16[32,32], index: 2, kind: input, shape index: {}]   ;;  %s1193_s3 = inlined_call_operand.vmem [shape: f32[1,32], index: 3, kind: input, shape index: {}]   ;;  %s1194_s4 = inlined_call_operand.hbm [shape: bf16[32,32], index: 4, kind: input, shape index: {}]   ;;  %s1195_s5 = inlined_call_operand.vmem [shape: f32[1,32], index: 5, kind: input, shape index: {}]   ;;  %s1196_s6 = inlined_call_operand.hbm [shape: f32[2,8,32], index: 6, kind: output, shape index: {}]  }
   0x1   :  { %1203 = sst [smem:[#allocation22_spill]] %s1192_s2 }
   0x2   :  { %1204 = sst [smem:[#allocation23_spill]] %s1194_s4 }
   0x3   :  { %11 = vsyncpa [#allocation3], 0 }
   0x4   :  { %13 = vsyncpa [#allocation3 + $0x1], 0 }
   0x5   :  { %14 = vsyncpa [#allocation6], 0 }
   0x6   :  { %16 = vsyncpa [#allocation6 + $0x1], 0 }
   0x7   :  { %17 = vsyncpa [#allocation9], 0 }
   0x8   :  { %18 = vsyncpa [#allocation4], 0 }
   0x9   :  { %20 = vsyncpa [#allocation4 + $0x1], 0  ;;  %s1006_s21 = smov 0   ;;  %s1008_s22 = smov 0  }
   0xa   :  { %s1010_s23 = smov 0   ;;  %s1012_s24 = smov 0  }
   0xb   :  { %s1014_s25 = smov 0   ;;  %s1016_s26 = smov 0  }
   0xc LB: > { %1205 = sst [smem:[#allocation16_spill]] %s944_s21  ;;  %s1037_s27 = sadd.s32 4294967295, %s964_s26   ;;  %s964_s26 = sphi %s1016_s26, %s26_s26   ;;  %s960_s25 = sphi %s1014_s25, %s1227_s25   ;;  %s956_s24 = sphi %s1012_s24, %s1226_s24   ;;  %s952_s23 = sphi %s1010_s23, %s1222_s23   ;;  %s948_s22 = sphi %s1008_s22, %s1225_s22   ;;  %s944_s21 = sphi %s1006_s21, %s1224_s21  }
   0xd   : > { %1206 = sst [smem:[#allocation17_spill]] %s952_s23  ;;  %p613_p0 = scmp.ge.s32.totalorder %s964_s26, 1 }
   0xe   : > { %p61_p1 = scmp.eq.s32.totalorder %s1037_s27, 0  ;;  %p209_p2 = scmp.lt.s32.totalorder %s964_s26, 3 }
   0xf   : > { %s1207_s2 = sld [smem:[#allocation22_spill]]  ;;  %s966_s8 = smov [#allocation7]  }
  0x10   : > { %p1045_p3 = pnand %p613_p0, %p209_p2  ;;  %s222_s9 = sshll.u32 %s966_s8, 4  ;;  %s223_s9 = int_to_ptr.vmem [resolvable:$true] %s222_s9 }
  0x11   : > { %p616_p6 = scmp.ge.s32.totalorder %s964_s26, 2  ;;  %s1209_s4 = sld [smem:[#allocation23_spill]] }
  0x12   : > { %p667_p4 = pneg %p1045_p3  ;;  %s967_s13 = smov 64  }
  0x13   : > { %s968_s14 = smov 4   ;;  %s969_s15 = smov [#allocation8]  }
  0x14   : > { %p668_p5 = pnand %p667_p4, %p61_p1  ;;  %s239_s16 = sshll.u32 %s969_s15, 4  ;;  %s240_s16 = int_to_ptr.vmem [resolvable:$true] %s239_s16 }
  0x15   : > { %s220_s30 = sshll.u32 %s1207_s2, 4  ;;  %s612_s17 = sadd.s32 4294967294, %s964_s26   ;;  %s221_s30 = int_to_ptr.hbm [resolvable:$true] %s220_s30 }
  0x16   : > { %670 = dma.hbm_to_vmem [thread:$0]  (!%p668_p5), %s221_s30, 256, %s223_s9, [#allocation6], %s967_s13, %s967_s13, %s968_s14  }
  0x17   : > { %s237_s12 = sshll.u32 %s1209_s4, 4  ;;  %s38_s18 = sadd.s32 1, %s960_s25  ;;  %s238_s12 = int_to_ptr.hbm [resolvable:$true] %s237_s12 }
  0x18   : > { %673 = dma.hbm_to_vmem [thread:$0]  (!%p668_p5), %s238_s12, 256, %s240_s16, [#allocation9], %s967_s13, %s967_s13, %s968_s14  }
  0x19   : > { %p40_p7 = scmp.ge.s32.totalorder %s38_s18, 2  ;;  %s47_s19 = sadd.s32 1, %s952_s23 }
  0x1a   : > { %p54_p8 = scmp.ne.s32.totalorder %s952_s23, %s948_s22  ;;  %p55_p9 = scmp.eq.s32.totalorder %s964_s26, 0 }
  0x1b   : > { %s1229_s18 = smov (%p40_p7, %s38_s18), 0  ;;  %p60_p11 = scmp.ne.s32.totalorder %s948_s22, %s944_s21 }
  0x1c   : > { %1210 = sst [smem:[#allocation18_spill]] %s1229_s18  ;;  %p1065_p10 = por %p55_p9, %p54_p8 }
  0x1d   : > { %s42_s28 = ssub.s32 %s960_s25, %s1229_s18  ;;  %p196_p12 = scmp.eq.s32.totalorder %s1037_s27, 1 }
  0x1e   : > { %p45_p13 = scmp.eq.s32.totalorder %s42_s28, 0  ;;  %p1076_p0 = por %p61_p1, %p60_p11 }
  0x1f   : > { %p1080_p2 = por %p196_p12, %p54_p8  ;;  %p202_p4 = scmp.eq.s32.totalorder %s612_s17, 1 }
  0x20   : > { %s1085_s8 = scalar_select %p45_p13, %s952_s23, %s47_s19  }
  0x21   : > { %s1213_s30 = scalar_select %p1080_p2, 1, 0 }
  0x22   : > { %1215 = sst [smem:[#allocation20_spill]] %s1085_s8  ;;  %p1087_p5 = por %p202_p4, %p60_p11 }
  0x23   : > { %1214 = sst [smem:[#allocation19_spill]] %s1213_s30  ;;  %p687_p7 = scmp.lt.s32.totalorder %s964_s26, 2 }
  0x24   : > { %s1216_s9 = scalar_select %p1087_p5, 1, 0 }
  0x25   : > { %s256_s10 = sand.u32 1, %s952_s23   ;;  %s618_s11 = sshll.u32 %s960_s25, 3 }
  0x26   : > { %1217 = sst [smem:[#allocation21_spill]] %s1216_s9  ;;  %s617_s12 = sshll.u32 %s256_s10, 3 }
  0x27   : > { %s265_s15 = scalar_lea.hbm %s1190_s0, %s618_s11  ;;  %s260_s28 = scalar_lea.vmem [#allocation2], %s617_s12 }
  0x28   : > { %s267_s16 = sshll.u32 %s265_s15, 4  ;;  %s269_s2 = sshll.u32 %s260_s28, 4  ;;  %s268_s16 = int_to_ptr.hbm [resolvable:$true] %s267_s16  ;;  %s270_s2 = int_to_ptr.vmem [resolvable:$true] %s269_s2 }
  0x29   : > { %p675_p8 = pnand %p687_p7, %p1065_p10  ;;  %s276_s17 = sand.u32 1, %s964_s26  }
  0x2a   : > { %s619_s19 = sshll.u32 %s256_s10, 1  ;;  %s257_s4 = scalar_lea.sflag [#allocation3], %s256_s10 }
  0x2b   : > { %677 = dma.hbm_to_vmem [thread:$0]  (!%p675_p8), %s268_s16, 128, %s270_s2, %s257_s4  }
  0x2c   : > { %s620_s18 = sshll.u32 %s960_s25, 1  ;;  %s280_s8 = scalar_lea.vmem [#allocation5], %s619_s19 }
  0x2d   : > { %s288_s23 = sshll.u32 %s280_s8, 4  ;;  %s284_s30 = scalar_lea.hbm %s1191_s1, %s620_s18  ;;  %s289_s23 = int_to_ptr.vmem [resolvable:$true] %s288_s23 }
  0x2e   : > { %s286_s11 = sshll.u32 %s284_s30, 4  ;;  %s277_s12 = scalar_lea.sflag [#allocation6], %s276_s17  ;;  %s287_s11 = int_to_ptr.hbm [resolvable:$true] %s286_s11 }
  0x2f   : > { %680 = dma.hbm_to_vmem [thread:$0]  (!%p675_p8), %s287_s11, 32, %s289_s23, %s277_s12  }
  0x30   : > { %297 = sbr.rel (%p1045_p3) target bundleno = 598 (0x256), region = 44  ;;  %s1107_s20 = sand.u32 (!%p1045_p3), 1, %s948_s22  }
  0x31   : > { %s622_s2 = sshll.u32 (!%p1045_p3), %s1107_s20, 3  ;;  %s300_s4 = scalar_lea.sflag (!%p1045_p3), [#allocation3], %s1107_s20 }
  0x32   : > { %s303_s21 = scalar_lea.vmem (!%p1045_p3), [#allocation2], %s622_s2 }
  0x35   : > { %923 = dma.done.wait (%p1076_p0), %s300_s4, 128  }
  0x36   : > { %925 = vsyncadd (%p1076_p0), %s300_s4, 4294967168  ;;  %s309_s23 = sand.u32 1, %s1037_s27   ;;  %s623_s7 = sshll.u32 %s1107_s20, 1 }
  0x37   : > { %s310_s18 = scalar_lea.sflag [#allocation6], %s309_s23  ;;  %s1119_s30 = scalar_lea.vmem [#allocation5], %s623_s7 }
  0x38   : > { %927 = dma.done.wait (%p1076_p0), %s310_s18, 32  }
  0x39   : > { %929 = vsyncadd (%p1076_p0), %s310_s18, 4294967264 }
  0x3a   : > { %931 = dma.done.wait (%p61_p1), [#allocation6], 256  }
  0x3b   : > { %933 = vsyncadd (%p61_p1), [#allocation6], 4294967040 }
  0x3c   : > { %935 = dma.done.wait (%p61_p1), [#allocation9], 256  }
  0x3d   : > { %937 = vsyncadd (%p61_p1), [#allocation9], 4294967040  ;;  %vm361_vm0 = vcmask 261120   ;;  %v1133_v0 = vld [vmem:[%s303_s21] sm:$0xff]  ;;  %v970_v2 = vmov 32.0   ;;  %v649_v15 = vld [vmem:[#allocation7] sm:$0xff] }
  0x3e   : > { %v362_v1 = vsel %vm361_vm0, %v1133_v0, 0.0  ;;  %746 = vrcp.f32 %v970_v2  ;;  %v650_v14 = vld [vmem:[#allocation7 + $0x8] sm:$0xff]  ;;  %v360_v24 = vld [vmem:[%s1119_s30] sm:$0x3]  ;;  %v651_v34 = vld [vmem:[#allocation8] sm:$0xff]  ;;  %s646_s8 = sshll.u32 %s956_s24, 3 }
  0x3f   : > { %363 = vadd.xlane.f32.xlu0 %v362_v1  ;;  %425 = vmatpush.bf16.msra.mxu0 %v650_v14  ;;  %v391_v26 = vperm.slane %v360_v24, 0  ;;  %v393_v29 = vperm.slane %v360_v24, 1  ;;  %v652_v33 = vld [vmem:[#allocation8 + $0x8] sm:$0xff]  ;;  %v744_v35 = vld [vmem:[%s1193_s3] ss:$0 sm:$0xff]  ;;  %s484_s16 = scalar_lea.hbm %s1196_s6, %s646_s8  ;;  %s357_s28 = scalar_lea.vmem [#allocation10], %s622_s2 }
  0x40   : > { %463 = vmatpush.bf16.msra.mxu1 %v652_v33  ;;  %v745_v41 = vld [vmem:[%s1195_s5] ss:$0 sm:$0xff]  ;;  %s486_s17 = sshll.u32 %s357_s28, 4  ;;  %s488_s19 = sshll.u32 %s484_s16, 4  ;;  %s487_s17 = int_to_ptr.vmem [resolvable:$true] %s486_s17  ;;  %s489_s19 = int_to_ptr.hbm [resolvable:$true] %s488_s19 }
  0x41   : > { %s473_s24 = scalar_lea.sflag [#allocation4], %s1107_s20  ;;  %s884_s11 = sshra.s32 %s489_s19, 4  ;;  %s885_s11 = int_to_ptr.hbm [resolvable:$true] %s884_s11 }
  0x42   : > { %s886_s12 = scalar_lea.hbm %s885_s11, 8  ;;  %s890_s2 = scalar_lea.hbm %s1196_s6, 16 }
  0x43   : > { %426 = vmatpush.bf16.msra.mxu0 %v649_v15  ;;  %p887_p1 = scmp.ne.s32.totalorder %s885_s11, %s886_s12  ;;  %p891_p10 = scmp.lt.s32.totalorder %s885_s11, %s1196_s6 }
  0x44   : > { %v747_v3 = vpop.eup %746  ;;  %464 = vmatpush.bf16.msra.mxu1 %v651_v34  ;;  %p892_p11 = scmp.lt.s32.totalorder %s890_s2, %s886_s12 }
  0x45   : > { %v366_v4 = vmul.f32 32.0, %v747_v3  ;;  %vm370_vm1 = vweird.f32 %v747_v3  ;;  %p888_p3 = pnand %p887_p1, %p1080_p2 }
  0x46   : > { %p893_p12 = por %p892_p11, %p891_p10 }
  0x47   : > { %v367_v5 = vsub.f32 1.0, %v366_v4  ;;  %p889_p9 = pneg %p888_p3 }
  0x49   : > { %v368_v6 = vmul.f32 %v747_v3, %v367_v5  ;;  %p894_p13 = pnand %p893_p12, %p889_p9 }
  0x4b   : > { %v369_v7 = vadd.f32 %v747_v3, %v368_v6 }
  0x4d   : > { %v371_v8 = vsel %vm370_vm1, %v747_v3, %v369_v7 }
  0xb2   : > { %v364_v9 = vpop.xlane.xlu0 %363 }
  0xb3   : > { %v372_v10 = vmul.f32 %v371_v8, %v364_v9 }
  0xb5   : > { %v373_v11 = vsub.f32 %v1133_v0, %v372_v10 }
  0xb7   : > { %v374_v12 = vmul.f32 %v373_v11, %v373_v11 }
  0xb9   : > { %v375_v13 = vsel %vm361_vm0, %v374_v12, 0.0 }
  0xba   : > { %376 = vadd.xlane.f32.xlu0 %v375_v13 }
 0x12d   : > { %v377_v16 = vpop.xlane.xlu0 %376 }
 0x12e   : > { %v378_v17 = vmul.f32 %v377_v16, %v371_v8 }
 0x130   : > { %v379_v18 = vadd.f32 1e-05, %v378_v17 }
 0x132   : > { %748 = vrsqrt.f32 %v379_v18  ;;  %vm386_vm3 = vweird.f32 %v379_v18 }
 0x138   : > { %v749_v19 = vpop.eup %748 }
 0x139   : > { %v381_v20 = vmul.f32 %v749_v19, %v379_v18  ;;  %vm387_vm2 = vweird.f32 %v749_v19 }
 0x13a   : > { %vm388_vm4 = vmor %vm386_vm3, %vm387_vm2 }
 0x13b   : > { %v382_v21 = vmul.f32 %v749_v19, %v381_v20 }
 0x13d   : > { %v383_v22 = vmul.f32 0.5, %v382_v21 }
 0x13f   : > { %v384_v23 = vsub.f32 1.5, %v383_v22 }
 0x141   : > { %v385_v25 = vmul.f32 %v749_v19, %v384_v23 }
 0x143   : > { %v389_v27 = vsel %vm388_vm4, %v749_v19, %v385_v25 }
 0x144   : > { %v390_v28 = vmul.f32 %v389_v27, %v373_v11 }
 0x146   : > { %v392_v30 = vmul.f32 %v391_v26, %v390_v28 }
 0x148   : > { %v394_v31 = vadd.f32 %v393_v29, %v392_v30 }
 0x14a   : > { %v395_v32 = vpack.c.bf16 %v394_v31, %v394_v31 }
 0x14c   : > { %635 = vmatmul.msk.bf16.vlgmr.msra.gmra.mxu0 %vm361_vm0, %v395_v32 }
 0x1c9   : > { %v428_v36 = vpop.f32.mrf.mxu0 }
 0x1ca   : > { %v429_v37 = vadd.f32 %v744_v35, %v428_v36 }
 0x1cc   : > { %v432_v38 = vmax.f32 %v429_v37, 0.0 }
 0x1ce   : > { %v433_v39 = vpack.c.bf16 %v432_v38, %v432_v38 }
 0x1d0   : > { %644 = vmatmul.msk.bf16.vlgmr.msra.gmra.mxu1 %vm361_vm0, %v433_v39 }
 0x1d1   : > { %v430_v40 = vpop.f32.mrf.mxu0 }
 0x24d   : > { %v466_v42 = vpop.f32.mrf.mxu1 }
 0x24e   : > { %v467_v43 = vadd.f32 %v745_v41, %v466_v42 }
 0x250   : > { %v470_v44 = vadd.f32 %v467_v43, %v1133_v0 }
 0x252   : > { %471 = vst.msk [vmem:[%s357_s28] sm:$0xff] %vm361_vm0, %v470_v44 }
 0x253   : > { %897 = shalt.err (!%p894_p13)
}
 0x254   : > { %665 = dma.vmem_to_hbm [thread:$0]  (%p1080_p2), %s487_s17, 128, %s489_s19, %s473_s24  }
 0x255   : > { %v468_v45 = vpop.f32.mrf.mxu1 }
 0x256 PF: > { %s1219_s20 = sld [smem:[#allocation16_spill]]  ;;  %p682_p0 = pnand %p616_p6, %p1087_p5 }
 0x258   : > { %p683_p4 = pneg %p682_p0 }
 0x25c   : > { %s500_s30 = sand.u32 1, %s1219_s20  }
 0x25d   : > { %s501_s27 = scalar_lea.sflag [#allocation4], %s500_s30 }
 0x25e   : > { %939 = dma.done.wait (%p683_p4), %s501_s27, 128  }
 0x25f   : > { %941 = vsyncadd (%p683_p4), %s501_s27, 4294967168  ;;  %s26_s26 = sadd.s32 1, %s964_s26   ;;  %s1221_s29 = sld [smem:[#allocation17_spill]] }
 0x260   : > { %p23_p7 = scmp.ge.s32.totalorder %s26_s26, 4   ;;  %s1222_s23 = sld [smem:[#allocation20_spill]] }
 0x261   : > { %s1223_s8 = sld [smem:[#allocation18_spill]]  ;;  %s1224_s21 = smov %s948_s22 }
 0x262   : > { %s1226_s24 = smov %s960_s25 }
 0x263   :  { %25 = sbr.rel (!%p23_p7) target bundleno = 12 (0xc), region = 110 }
 0x265   : > { %s1225_s22 = smov %s1221_s29 }
 0x267   : > { %s1227_s25 = smov %s1223_s8 }
 0x268   :  { %507 = vsyncpa [#allocation3], 1 }
 0x269   :  { %509 = vsyncpa [#allocation3 + $0x1], 1 }
 0x26a   :  { %510 = vsyncpa [#allocation6], 1 }
 0x26b   :  { %512 = vsyncpa [#allocation6 + $0x1], 1 }
 0x26c   :  { %513 = vsyncpa [#allocation9], 1 }
 0x26d   :  { %514 = vsyncpa [#allocation4], 1 }
 0x26e   :  { %516 = vsyncpa [#allocation4 + $0x1], 1 }

// kernel: tpu_custom_call.1
= control target key start
LH: loop header
LB: loop body
LE: loop exit
PB: predicated region body
PF: predicated region fallthrough
CT: control target
= control target key end

     0   :  { %s1190_s0 = inlined_call_operand.hbm [shape: f32[2,8,32], index: 0, kind: input, shape index: {}]   ;;  %s1191_s1 = inlined_call_operand.hbm [shape: f32[2,2,32], index: 1, kind: input, shape index: {}]   ;;  %s1192_s2 = inlined_call_operand.hbm [shape: bf16[32,32], index: 2, kind: input, shape index: {}]   ;;  %s1193_s3 = inlined_call_operand.vmem [shape: f32[1,32], index: 3, kind: input, shape index: {}]   ;;  %s1194_s4 = inlined_call_operand.hbm [shape: bf16[32,32], index: 4, kind: input, shape index: {}]   ;;  %s1195_s5 = inlined_call_operand.vmem [shape: f32[1,32], index: 5, kind: input, shape index: {}]   ;;  %s1196_s6 = inlined_call_operand.hbm [shape: f32[2,8,32], index: 6, kind: output, shape index: {}]  }
   0x1   :  { %1203 = sst [smem:[#allocation22_spill]] %s1192_s2 }
   0x2   :  { %1204 = sst [smem:[#allocation23_spill]] %s1194_s4 }
   0x3   :  { %11 = vsyncpa [#allocation3], 0 }
   0x4   :  { %13 = vsyncpa [#allocation3 + $0x1], 0 }
   0x5   :  { %14 = vsyncpa [#allocation6], 0 }
   0x6   :  { %16 = vsyncpa [#allocation6 + $0x1], 0 }
   0x7   :  { %17 = vsyncpa [#allocation9], 0 }
   0x8   :  { %18 = vsyncpa [#allocation4], 0 }
   0x9   :  { %20 = vsyncpa [#allocation4 + $0x1], 0  ;;  %s1006_s21 = smov 0   ;;  %s1008_s22 = smov 0  }
   0xa   :  { %s1010_s23 = smov 0   ;;  %s1012_s24 = smov 0  }
   0xb   :  { %s1014_s25 = smov 0   ;;  %s1016_s26 = smov 0  }
   0xc LB: > { %1205 = sst [smem:[#allocation16_spill]] %s944_s21  ;;  %s1037_s27 = sadd.s32 4294967295, %s964_s26   ;;  %s964_s26 = sphi %s1016_s26, %s26_s26   ;;  %s960_s25 = sphi %s1014_s25, %s1227_s25   ;;  %s956_s24 = sphi %s1012_s24, %s1226_s24   ;;  %s952_s23 = sphi %s1010_s23, %s1222_s23   ;;  %s948_s22 = sphi %s1008_s22, %s1225_s22   ;;  %s944_s21 = sphi %s1006_s21, %s1224_s21  }
   0xd   : > { %1206 = sst [smem:[#allocation17_spill]] %s952_s23  ;;  %p613_p0 = scmp.ge.s32.totalorder %s964_s26, 1 }
   0xe   : > { %p61_p1 = scmp.eq.s32.totalorder %s1037_s27, 0  ;;  %p209_p2 = scmp.lt.s32.totalorder %s964_s26, 3 }
   0xf   : > { %s1207_s2 = sld [smem:[#allocation22_spill]]  ;;  %s966_s8 = smov [#allocation7]  }
  0x10   : > { %p1045_p3 = pnand %p613_p0, %p209_p2  ;;  %s222_s9 = sshll.u32 %s966_s8, 4  ;;  %s223_s9 = int_to_ptr.vmem [resolvable:$true] %s222_s9 }
  0x11   : > { %p616_p6 = scmp.ge.s32.totalorder %s964_s26, 2  ;;  %s1209_s4 = sld [smem:[#allocation23_spill]] }
  0x12   : > { %p667_p4 = pneg %p1045_p3  ;;  %s967_s13 = smov 64  }
  0x13   : > { %s968_s14 = smov 4   ;;  %s969_s15 = smov [#allocation8]  }
  0x14   : > { %p668_p5 = pnand %p667_p4, %p61_p1  ;;  %s239_s16 = sshll.u32 %s969_s15, 4  ;;  %s240_s16 = int_to_ptr.vmem [resolvable:$true] %s239_s16 }
  0x15   : > { %s220_s30 = sshll.u32 %s1207_s2, 4  ;;  %s612_s17 = sadd.s32 4294967294, %s964_s26   ;;  %s221_s30 = int_to_ptr.hbm [resolvable:$true] %s220_s30 }
  0x16   : > { %670 = dma.hbm_to_vmem [thread:$0]  (!%p668_p5), %s221_s30, 256, %s223_s9, [#allocation6], %s967_s13, %s967_s13, %s968_s14  }
  0x17   : > { %s237_s12 = sshll.u32 %s1209_s4, 4  ;;  %s38_s18 = sadd.s32 1, %s960_s25  ;;  %s238_s12 = int_to_ptr.hbm [resolvable:$true] %s237_s12 }
  0x18   : > { %673 = dma.hbm_to_vmem [thread:$0]  (!%p668_p5), %s238_s12, 256, %s240_s16, [#allocation9], %s967_s13, %s967_s13, %s968_s14  }
  0x19   : > { %p40_p7 = scmp.ge.s32.totalorder %s38_s18, 2  ;;  %s47_s19 = sadd.s32 1, %s952_s23 }
  0x1a   : > { %p54_p8 = scmp.ne.s32.totalorder %s952_s23, %s948_s22  ;;  %p55_p9 = scmp.eq.s32.totalorder %s964_s26, 0 }
  0x1b   : > { %s1229_s18 = smov (%p40_p7, %s38_s18), 0  ;;  %p60_p11 = scmp.ne.s32.totalorder %s948_s22, %s944_s21 }
  0x1c   : > { %1210 = sst [smem:[#allocation18_spill]] %s1229_s18  ;;  %p1065_p10 = por %p55_p9, %p54_p8 }
  0x1d   : > { %s42_s28 = ssub.s32 %s960_s25, %s1229_s18  ;;  %p196_p12 = scmp.eq.s32.totalorder %s1037_s27, 1 }
  0x1e   : > { %p45_p13 = scmp.eq.s32.totalorder %s42_s28, 0  ;;  %p1076_p0 = por %p61_p1, %p60_p11 }
  0x1f   : > { %p1080_p2 = por %p196_p12, %p54_p8  ;;  %p202_p4 = scmp.eq.s32.totalorder %s612_s17, 1 }
  0x20   : > { %s1085_s8 = scalar_select %p45_p13, %s952_s23, %s47_s19  }
  0x21   : > { %s1213_s30 = scalar_select %p1080_p2, 1, 0 }
  0x22   : > { %1215 = sst [smem:[#allocation20_spill]] %s1085_s8  ;;  %p1087_p5 = por %p202_p4, %p60_p11 }
  0x23   : > { %1214 = sst [smem:[#allocation19_spill]] %s1213_s30  ;;  %p687_p7 = scmp.lt.s32.totalorder %s964_s26, 2 }
  0x24   : > { %s1216_s9 = scalar_select %p1087_p5, 1, 0 }
  0x25   : > { %s256_s10 = sand.u32 1, %s952_s23   ;;  %s618_s11 = sshll.u32 %s960_s25, 3 }
  0x26   : > { %1217 = sst [smem:[#allocation21_spill]] %s1216_s9  ;;  %s617_s12 = sshll.u32 %s256_s10, 3 }
  0x27   : > { %s265_s15 = scalar_lea.hbm %s1190_s0, %s618_s11  ;;  %s260_s28 = scalar_lea.vmem [#allocation2], %s617_s12 }
  0x28   : > { %s267_s16 = sshll.u32 %s265_s15, 4  ;;  %s269_s2 = sshll.u32 %s260_s28, 4  ;;  %s268_s16 = int_to_ptr.hbm [resolvable:$true] %s267_s16  ;;  %s270_s2 = int_to_ptr.vmem [resolvable:$true] %s269_s2 }
  0x29   : > { %p675_p8 = pnand %p687_p7, %p1065_p10  ;;  %s276_s17 = sand.u32 1, %s964_s26  }
  0x2a   : > { %s619_s19 = sshll.u32 %s256_s10, 1  ;;  %s257_s4 = scalar_lea.sflag [#allocation3], %s256_s10 }
  0x2b   : > { %677 = dma.hbm_to_vmem [thread:$0]  (!%p675_p8), %s268_s16, 128, %s270_s2, %s257_s4  }
  0x2c   : > { %s620_s18 = sshll.u32 %s960_s25, 1  ;;  %s280_s8 = scalar_lea.vmem [#allocation5], %s619_s19 }
  0x2d   : > { %s288_s23 = sshll.u32 %s280_s8, 4  ;;  %s284_s30 = scalar_lea.hbm %s1191_s1, %s620_s18  ;;  %s289_s23 = int_to_ptr.vmem [resolvable:$true] %s288_s23 }
  0x2e   : > { %s286_s11 = sshll.u32 %s284_s30, 4  ;;  %s277_s12 = scalar_lea.sflag [#allocation6], %s276_s17  ;;  %s287_s11 = int_to_ptr.hbm [resolvable:$true] %s286_s11 }
  0x2f   : > { %680 = dma.hbm_to_vmem [thread:$0]  (!%p675_p8), %s287_s11, 32, %s289_s23, %s277_s12  }
  0x30   : > { %297 = sbr.rel (%p1045_p3) target bundleno = 598 (0x256), region = 44  ;;  %s1107_s20 = sand.u32 (!%p1045_p3), 1, %s948_s22  }
  0x31   : > { %s622_s2 = sshll.u32 (!%p1045_p3), %s1107_s20, 3  ;;  %s300_s4 = scalar_lea.sflag (!%p1045_p3), [#allocation3], %s1107_s20 }
  0x32   : > { %s303_s21 = scalar_lea.vmem (!%p1045_p3), [#allocation2], %s622_s2 }
  0x35   : > { %923 = dma.done.wait (%p1076_p0), %s300_s4, 128  }
  0x36   : > { %925 = vsyncadd (%p1076_p0), %s300_s4, 4294967168  ;;  %s309_s23 = sand.u32 1, %s1037_s27   ;;  %s623_s7 = sshll.u32 %s1107_s20, 1 }
  0x37   : > { %s310_s18 = scalar_lea.sflag [#allocation6], %s309_s23  ;;  %s1119_s30 = scalar_lea.vmem [#allocation5], %s623_s7 }
  0x38   : > { %927 = dma.done.wait (%p1076_p0), %s310_s18, 32  }
  0x39   : > { %929 = vsyncadd (%p1076_p0), %s310_s18, 4294967264 }
  0x3a   : > { %931 = dma.done.wait (%p61_p1), [#allocation6], 256  }
  0x3b   : > { %933 = vsyncadd (%p61_p1), [#allocation6], 4294967040 }
  0x3c   : > { %935 = dma.done.wait (%p61_p1), [#allocation9], 256  }
  0x3d   : > { %937 = vsyncadd (%p61_p1), [#allocation9], 4294967040  ;;  %vm361_vm0 = vcmask 261120   ;;  %v1133_v0 = vld [vmem:[%s303_s21] sm:$0xff]  ;;  %v970_v2 = vmov 32.0   ;;  %v649_v15 = vld [vmem:[#allocation7] sm:$0xff] }
  0x3e   : > { %v362_v1 = vsel %vm361_vm0, %v1133_v0, 0.0  ;;  %746 = vrcp.f32 %v970_v2  ;;  %v650_v14 = vld [vmem:[#allocation7 + $0x8] sm:$0xff]  ;;  %v360_v24 = vld [vmem:[%s1119_s30] sm:$0x3]  ;;  %v651_v34 = vld [vmem:[#allocation8] sm:$0xff]  ;;  %s646_s8 = sshll.u32 %s956_s24, 3 }
  0x3f   : > { %363 = vadd.xlane.f32.xlu0 %v362_v1  ;;  %425 = vmatpush.bf16.msra.mxu0 %v650_v14  ;;  %v391_v26 = vperm.slane %v360_v24, 0  ;;  %v393_v29 = vperm.slane %v360_v24, 1  ;;  %v652_v33 = vld [vmem:[#allocation8 + $0x8] sm:$0xff]  ;;  %v744_v35 = vld [vmem:[%s1193_s3] ss:$0 sm:$0xff]  ;;  %s484_s16 = scalar_lea.hbm %s1196_s6, %s646_s8  ;;  %s357_s28 = scalar_lea.vmem [#allocation10], %s622_s2 }
  0x40   : > { %463 = vmatpush.bf16.msra.mxu1 %v652_v33  ;;  %v745_v41 = vld [vmem:[%s1195_s5] ss:$0 sm:$0xff]  ;;  %s486_s17 = sshll.u32 %s357_s28, 4  ;;  %s488_s19 = sshll.u32 %s484_s16, 4  ;;  %s487_s17 = int_to_ptr.vmem [resolvable:$true] %s486_s17  ;;  %s489_s19 = int_to_ptr.hbm [resolvable:$true] %s488_s19 }
  0x41   : > { %s473_s24 = scalar_lea.sflag [#allocation4], %s1107_s20  ;;  %s884_s11 = sshra.s32 %s489_s19, 4  ;;  %s885_s11 = int_to_ptr.hbm [resolvable:$true] %s884_s11 }
  0x42   : > { %s886_s12 = scalar_lea.hbm %s885_s11, 8  ;;  %s890_s2 = scalar_lea.hbm %s1196_s6, 16 }
  0x43   : > { %426 = vmatpush.bf16.msra.mxu0 %v649_v15  ;;  %p887_p1 = scmp.ne.s32.totalorder %s885_s11, %s886_s12  ;;  %p891_p10 = scmp.lt.s32.totalorder %s885_s11, %s1196_s6 }
  0x44   : > { %v747_v3 = vpop.eup %746  ;;  %464 = vmatpush.bf16.msra.mxu1 %v651_v34  ;;  %p892_p11 = scmp.lt.s32.totalorder %s890_s2, %s886_s12 }
  0x45   : > { %v366_v4 = vmul.f32 32.0, %v747_v3  ;;  %vm370_vm1 = vweird.f32 %v747_v3  ;;  %p888_p3 = pnand %p887_p1, %p1080_p2 }
  0x46   : > { %p893_p12 = por %p892_p11, %p891_p10 }
  0x47   : > { %v367_v5 = vsub.f32 1.0, %v366_v4  ;;  %p889_p9 = pneg %p888_p3 }
  0x49   : > { %v368_v6 = vmul.f32 %v747_v3, %v367_v5  ;;  %p894_p13 = pnand %p893_p12, %p889_p9 }
  0x4b   : > { %v369_v7 = vadd.f32 %v747_v3, %v368_v6 }
  0x4d   : > { %v371_v8 = vsel %vm370_vm1, %v747_v3, %v369_v7 }
  0xb2   : > { %v364_v9 = vpop.xlane.xlu0 %363 }
  0xb3   : > { %v372_v10 = vmul.f32 %v371_v8, %v364_v9 }
  0xb5   : > { %v373_v11 = vsub.f32 %v1133_v0, %v372_v10 }
  0xb7   : > { %v374_v12 = vmul.f32 %v373_v11, %v373_v11 }
  0xb9   : > { %v375_v13 = vsel %vm361_vm0, %v374_v12, 0.0 }
  0xba   : > { %376 = vadd.xlane.f32.xlu0 %v375_v13 }
 0x12d   : > { %v377_v16 = vpop.xlane.xlu0 %376 }
 0x12e   : > { %v378_v17 = vmul.f32 %v377_v16, %v371_v8 }
 0x130   : > { %v379_v18 = vadd.f32 1e-05, %v378_v17 }
 0x132   : > { %748 = vrsqrt.f32 %v379_v18  ;;  %vm386_vm3 = vweird.f32 %v379_v18 }
 0x138   : > { %v749_v19 = vpop.eup %748 }
 0x139   : > { %v381_v20 = vmul.f32 %v749_v19, %v379_v18  ;;  %vm387_vm2 = vweird.f32 %v749_v19 }
 0x13a   : > { %vm388_vm4 = vmor %vm386_vm3, %vm387_vm2 }
 0x13b   : > { %v382_v21 = vmul.f32 %v749_v19, %v381_v20 }
 0x13d   : > { %v383_v22 = vmul.f32 0.5, %v382_v21 }
 0x13f   : > { %v384_v23 = vsub.f32 1.5, %v383_v22 }
 0x141   : > { %v385_v25 = vmul.f32 %v749_v19, %v384_v23 }
 0x143   : > { %v389_v27 = vsel %vm388_vm4, %v749_v19, %v385_v25 }
 0x144   : > { %v390_v28 = vmul.f32 %v389_v27, %v373_v11 }
 0x146   : > { %v392_v30 = vmul.f32 %v391_v26, %v390_v28 }
 0x148   : > { %v394_v31 = vadd.f32 %v393_v29, %v392_v30 }
 0x14a   : > { %v395_v32 = vpack.c.bf16 %v394_v31, %v394_v31 }
 0x14c   : > { %635 = vmatmul.msk.bf16.vlgmr.msra.gmra.mxu0 %vm361_vm0, %v395_v32 }
 0x1c9   : > { %v428_v36 = vpop.f32.mrf.mxu0 }
 0x1ca   : > { %v429_v37 = vadd.f32 %v744_v35, %v428_v36 }
 0x1cc   : > { %v432_v38 = vmax.f32 %v429_v37, 0.0 }
 0x1ce   : > { %v433_v39 = vpack.c.bf16 %v432_v38, %v432_v38 }
 0x1d0   : > { %644 = vmatmul.msk.bf16.vlgmr.msra.gmra.mxu1 %vm361_vm0, %v433_v39 }
 0x1d1   : > { %v430_v40 = vpop.f32.mrf.mxu0 }
 0x24d   : > { %v466_v42 = vpop.f32.mrf.mxu1 }
 0x24e   : > { %v467_v43 = vadd.f32 %v745_v41, %v466_v42 }
 0x250   : > { %v470_v44 = vadd.f32 %v467_v43, %v1133_v0 }
 0x252   : > { %471 = vst.msk [vmem:[%s357_s28] sm:$0xff] %vm361_vm0, %v470_v44 }
 0x253   : > { %897 = shalt.err (!%p894_p13)
}
 0x254   : > { %665 = dma.vmem_to_hbm [thread:$0]  (%p1080_p2), %s487_s17, 128, %s489_s19, %s473_s24  }
 0x255   : > { %v468_v45 = vpop.f32.mrf.mxu1 }
 0x256 PF: > { %s1219_s20 = sld [smem:[#allocation16_spill]]  ;;  %p682_p0 = pnand %p616_p6, %p1087_p5 }
 0x258   : > { %p683_p4 = pneg %p682_p0 }
 0x25c   : > { %s500_s30 = sand.u32 1, %s1219_s20  }
 0x25d   : > { %s501_s27 = scalar_lea.sflag [#allocation4], %s500_s30 }
 0x25e   : > { %939 = dma.done.wait (%p683_p4), %s501_s27, 128  }
 0x25f   : > { %941 = vsyncadd (%p683_p4), %s501_s27, 4294967168  ;;  %s26_s26 = sadd.s32 1, %s964_s26   ;;  %s1221_s29 = sld [smem:[#allocation17_spill]] }
 0x260   : > { %p23_p7 = scmp.ge.s32.totalorder %s26_s26, 4   ;;  %s1222_s23 = sld [smem:[#allocation20_spill]] }
 0x261   : > { %s1223_s8 = sld [smem:[#allocation18_spill]]  ;;  %s1224_s21 = smov %s948_s22 }
 0x262   : > { %s1226_s24 = smov %s960_s25 }
 0x263   :  { %25 = sbr.rel (!%p23_p7) target bundleno = 12 (0xc), region = 110 }
 0x265   : > { %s1225_s22 = smov %s1221_s29 }
 0x267   : > { %s1227_s25 = smov %s1223_s8 }
 0x268   :  { %507 = vsyncpa [#allocation3], 1 }
 0x269   :  { %509 = vsyncpa [#allocation3 + $0x1], 1 }
 0x26a   :  { %510 = vsyncpa [#allocation6], 1 }
 0x26b   :  { %512 = vsyncpa [#allocation6 + $0x1], 1 }
 0x26c   :  { %513 = vsyncpa [#allocation9], 1 }
 0x26d   :  { %514 = vsyncpa [#allocation4], 1 }
 0x26e   :  { %516 = vsyncpa [#allocation4 + $0x1], 1 }

</bundles_post_ra>
